<compile_context>
chip_gen: v7x
topology: tpu7x:2x2x1
jax: 0.10.0
libtpu: 0.0.40
codegen_flags: <defaults>
</compile_context>

<pallas_src>
import jax
import jax.numpy as jnp
from jax.experimental import pallas as pl
from jax.experimental.pallas import tpu as pltpu


def _mlp_kernel(x_ref, w1_ref, b1_ref, w2_ref, b2_ref, w3_ref, b3_ref, o_ref):
    # x: (F, tb) bf16, batch on the 128-wide lane axis (already lane-dense).
    xT = x_ref[...]

    # fc1 + relu: (64, F) @ (F, tb) -> (64, tb)   [MXU, f32 acc]
    h1 = jnp.dot(w1_ref[...], xT, preferred_element_type=jnp.float32) + b1_ref[...]
    h1 = jnp.maximum(h1, 0.0)

    # fc2 + relu: (32, 64) @ (64, tb) -> (32, tb) [MXU, f32 acc]
    h2 = jnp.dot(w2_ref[...], h1.astype(jnp.bfloat16),
                 preferred_element_type=jnp.float32) + b2_ref[...]
    h2 = jnp.maximum(h2, 0.0)

    # fc3 (32 -> 1): off the MXU — VPU broadcast-multiply + sublane (XLU) reduce.
    h3 = jnp.sum(w3_ref[...] * h2, axis=0, keepdims=True) + b3_ref[...]   # (1, tb)

    # Lane-dense output row; sigmoid on the EUP.
    o_ref[...] = jax.nn.sigmoid(h3)


def _round_up(a, m):
    return ((a + m - 1) // m) * m


def amujo_ann_forward(x, params, *, batch_tile=32768):
    """x: (B, input_size) float32 (PyTorch layout). params: PyTorch-convention weights.

    Returns (B, 1) float32 = sigmoid(relu(relu(x@W1^T+b1)@W2^T+b2)@W3^T+b3).
    """
    B, F = x.shape
    batch_tile = max(128, _round_up(batch_tile, 128))

    # Balanced tiling: n_tiles even-sized tiles, each a multiple of 128 lanes.
    # Padding is < 128 * n_tiles columns (negligible vs B) instead of a full
    # jnp.pad copy of x up to a multiple of batch_tile.
    n_tiles = pl.cdiv(B, batch_tile)
    tb = _round_up(pl.cdiv(B, n_tiles), 128)
    B_pad = n_tiles * tb
    pad = B_pad - B

    # One fused producer pass: transpose to (F, B) with the bf16 cast folded in,
    # plus the (small) lane padding.  The kernel then reads lane-dense bf16 tiles.
    xT = x.astype(jnp.bfloat16).T                       # (F, B) bf16
    if pad:
        xT = jnp.pad(xT, ((0, 0), (0, pad)))            # (F, B_pad) bf16

    # Glue: keep PyTorch (out, in) weight layout (kernel computes W @ x^T).
    w1 = params["w1"].astype(jnp.bfloat16)              # (64, F)   bf16 MXU operand
    b1 = params["b1"].reshape(-1, 1).astype(jnp.float32)   # (64, 1)
    w2 = params["w2"].astype(jnp.bfloat16)              # (32, 64)  bf16 MXU operand
    b2 = params["b2"].reshape(-1, 1).astype(jnp.float32)   # (32, 1)
    w3 = params["w3"].reshape(-1, 1).astype(jnp.float32)   # (32, 1)  VPU path
    b3 = params["b3"].reshape(1, 1).astype(jnp.float32)     # (1, 1)

    # Full-array specs with constant index maps: weights are DMA'd once, not per step.
    full = lambda a: pl.BlockSpec(a.shape, lambda i: (0,) * a.ndim)

    out = pl.pallas_call(
        _mlp_kernel,
        out_shape=jax.ShapeDtypeStruct((1, B_pad), jnp.float32),
        grid=(n_tiles,),
        in_specs=[
            pl.BlockSpec((F, tb), lambda i: (0, i)),     # x: lane-dense batch tiles
            full(w1), full(b1),
            full(w2), full(b2),
            full(w3), full(b3),
        ],
        out_specs=pl.BlockSpec((1, tb), lambda i: (0, i)),
        compiler_params=pltpu.CompilerParams(
            dimension_semantics=("parallel",),           # megacore sharding
            # Large tiles materialize h1/h2 intermediates in VMEM (~25 MiB at
            # tb=32768); 48 MiB is below v7x's 64 MiB physical and well under
            # v5e/v6e's 128 MiB.
            vmem_limit_bytes=48 * 1024 * 1024,
        ),
    )(xT, w1, b1, w2, b2, w3, b3)

    # (1, B_pad) -> (B, 1); drops the (tiny) padded columns.
    return out[0, :B].reshape(B, 1)


def init_params(key, input_size):
    """Deterministic init with shapes matching AmujoANN.__init__ (PyTorch layout)."""
    k1, k2, k3, k4, k5, k6 = jax.random.split(key, 6)

    def lin(kw, kb, out_f, in_f):
        bound = 1.0 / jnp.sqrt(in_f)
        w = jax.random.uniform(kw, (out_f, in_f), jnp.float32, -bound, bound)
        b = jax.random.uniform(kb, (out_f,), jnp.float32, -bound, bound)
        return w, b

    w1, b1 = lin(k1, k2, 64, input_size)
    w2, b2 = lin(k3, k4, 32, 64)
    w3, b3 = lin(k5, k6, 1, 32)
    return {"w1": w1, "b1": b1, "w2": w2, "b2": b2, "w3": w3, "b3": b3}


def reference_forward(x, p):
    h1 = jnp.maximum(x @ p["w1"].T + p["b1"], 0.0)
    h2 = jnp.maximum(h1 @ p["w2"].T + p["b2"], 0.0)
    return jax.nn.sigmoid(h2 @ p["w3"].T + p["b3"])


if __name__ == "__main__":
    key = jax.random.PRNGKey(0)
    kx, kp, kx2 = jax.random.split(key, 3)

    input_size = 16
    params = init_params(kp, input_size)

    # Case 1: tiny batch — single tile, tb rounded up to 128 (lane-dense output).
    x_small = jax.random.normal(kx, (8, input_size), jnp.float32)
    out_small = jax.block_until_ready(amujo_ann_forward(x_small, params))
    ref_small = reference_forward(x_small, params)
    assert out_small.shape == (8, 1)
    # bf16 MXU operands (f32 accumulation) -> relaxed tolerance vs f32 reference.
    assert jnp.allclose(out_small, ref_small, atol=2e-2, rtol=2e-2), "mismatch (small)"

    # Case 2: multi-tile grid with non-divisible batch (balanced tiles, tiny pad).
    x_big = jax.random.normal(kx2, (200, input_size), jnp.float32)
    out_big = jax.block_until_ready(
        amujo_ann_forward(x_big, params, batch_tile=128))
    ref_big = reference_forward(x_big, params)
    assert out_big.shape == (200, 1)
    assert jnp.allclose(out_big, ref_big, atol=2e-2, rtol=2e-2), "mismatch (big)"

    print("KERNEL_OK")
</pallas_src>

<mosaic_0001>
module attributes {stable_mosaic.version = 11 : i64} {
  func.func @_mlp_kernel(%arg0: i32, %arg1: memref<16x128xbf16, #tpu.memory_space<vmem>>, %arg2: memref<64x16xbf16, #tpu.memory_space<vmem>>, %arg3: memref<64x1xf32, #tpu.memory_space<vmem>>, %arg4: memref<32x64xbf16, #tpu.memory_space<vmem>>, %arg5: memref<32x1xf32, #tpu.memory_space<vmem>>, %arg6: memref<32x1xf32, #tpu.memory_space<vmem>>, %arg7: memref<1x1xf32, #tpu.memory_space<vmem>>, %arg8: memref<1x128xf32, #tpu.memory_space<vmem>>) attributes {dimension_semantics = [#tpu.dimension_semantics<parallel>], iteration_bounds = array<i64: 1>, scalar_prefetch = 0 : i64, scratch_operands = 0 : i64, tpu.core_type = #tpu.core_type<tc>, window_params = [{transform_indices = @transform_0, window_bounds = array<i64: 16, 128>}, {pipeline_mode = #tpu.pipeline_mode<synchronous>, transform_indices = @transform_1, window_bounds = array<i64: 64, 16>}, {pipeline_mode = #tpu.pipeline_mode<synchronous>, transform_indices = @transform_2, window_bounds = array<i64: 64, 1>}, {pipeline_mode = #tpu.pipeline_mode<synchronous>, transform_indices = @transform_3, window_bounds = array<i64: 32, 64>}, {pipeline_mode = #tpu.pipeline_mode<synchronous>, transform_indices = @transform_4, window_bounds = array<i64: 32, 1>}, {pipeline_mode = #tpu.pipeline_mode<synchronous>, transform_indices = @transform_5, window_bounds = array<i64: 32, 1>}, {pipeline_mode = #tpu.pipeline_mode<synchronous>, transform_indices = @transform_6, window_bounds = array<i64: 1, 1>}, {transform_indices = @transform_7, window_bounds = array<i64: 1, 128>}]} {
    %c0 = arith.constant 0 : index
    %c0_0 = arith.constant 0 : index
    %0 = vector.load %arg1[%c0, %c0_0] : memref<16x128xbf16, #tpu.memory_space<vmem>>, vector<16x128xbf16>
    %c0_1 = arith.constant 0 : index
    %c0_2 = arith.constant 0 : index
    %1 = vector.load %arg2[%c0_1, %c0_2] : memref<64x16xbf16, #tpu.memory_space<vmem>>, vector<64x16xbf16>
    %cst = arith.constant dense<0.000000e+00> : vector<64x128xf32>
    %2 = tpu.matmul %1, %0, %cst {dimension_numbers = #tpu.dot_dimension_numbers<[1], [0], [0], [1], [0, 0, 1, 1], [], []>} : vector<64x16xbf16>, vector<16x128xbf16>, vector<64x128xf32> -> vector<64x128xf32>
    %c0_3 = arith.constant 0 : index
    %c0_4 = arith.constant 0 : index
    %3 = vector.load %arg3[%c0_3, %c0_4] : memref<64x1xf32, #tpu.memory_space<vmem>>, vector<64x1xf32>
    %4 = vector.broadcast %3 : vector<64x1xf32> to vector<64x128xf32>
    %5 = arith.addf %2, %4 : vector<64x128xf32>
    %cst_5 = arith.constant 0.000000e+00 : f32
    %6 = vector.broadcast %cst_5 : f32 to vector<64x128xf32>
    %7 = arith.maximumf %5, %6 : vector<64x128xf32>
    %c0_6 = arith.constant 0 : index
    %c0_7 = arith.constant 0 : index
    %8 = vector.load %arg4[%c0_6, %c0_7] : memref<32x64xbf16, #tpu.memory_space<vmem>>, vector<32x64xbf16>
    %9 = arith.truncf %7 : vector<64x128xf32> to vector<64x128xbf16>
    %cst_8 = arith.constant dense<0.000000e+00> : vector<32x128xf32>
    %10 = tpu.matmul %8, %9, %cst_8 {dimension_numbers = #tpu.dot_dimension_numbers<[1], [0], [0], [1], [0, 0, 1, 1], [], []>} : vector<32x64xbf16>, vector<64x128xbf16>, vector<32x128xf32> -> vector<32x128xf32>
    %c0_9 = arith.constant 0 : index
    %c0_10 = arith.constant 0 : index
    %11 = vector.load %arg5[%c0_9, %c0_10] : memref<32x1xf32, #tpu.memory_space<vmem>>, vector<32x1xf32>
    %12 = vector.broadcast %11 : vector<32x1xf32> to vector<32x128xf32>
    %13 = arith.addf %10, %12 : vector<32x128xf32>
    %cst_11 = arith.constant 0.000000e+00 : f32
    %14 = vector.broadcast %cst_11 : f32 to vector<32x128xf32>
    %15 = arith.maximumf %13, %14 : vector<32x128xf32>
    %c0_12 = arith.constant 0 : index
    %c0_13 = arith.constant 0 : index
    %16 = vector.load %arg6[%c0_12, %c0_13] : memref<32x1xf32, #tpu.memory_space<vmem>>, vector<32x1xf32>
    %17 = vector.broadcast %16 : vector<32x1xf32> to vector<32x128xf32>
    %18 = arith.mulf %17, %15 : vector<32x128xf32>
    %cst_14 = arith.constant dense<0.000000e+00> : vector<128xf32>
    %19 = vector.multi_reduction <add>, %18, %cst_14 [0] : vector<32x128xf32> to vector<128xf32>
    %20 = vector.shape_cast %19 : vector<128xf32> to vector<1x128xf32>
    %c0_15 = arith.constant 0 : index
    %c0_16 = arith.constant 0 : index
    %21 = vector.load %arg7[%c0_15, %c0_16] : memref<1x1xf32, #tpu.memory_space<vmem>>, vector<1x1xf32>
    %22 = vector.broadcast %21 : vector<1x1xf32> to vector<1x128xf32>
    %23 = arith.addf %20, %22 : vector<1x128xf32>
    %24 = arith.negf %23 : vector<1x128xf32>
    %25 = math.exp %24 : vector<1x128xf32>
    %cst_17 = arith.constant 1.000000e+00 : f32
    %26 = vector.broadcast %cst_17 : f32 to vector<1x128xf32>
    %27 = arith.addf %26, %25 : vector<1x128xf32>
    %28 = arith.divf %26, %27 : vector<1x128xf32>
    %c0_18 = arith.constant 0 : index
    %c0_19 = arith.constant 0 : index
    %29 = vector.load %arg8[%c0_18, %c0_19] : memref<1x128xf32, #tpu.memory_space<vmem>>, vector<1x128xf32>
    tpu.vector_store %arg8[%c0_18, %c0_19], %28 {strides = array<i32>} : memref<1x128xf32, #tpu.memory_space<vmem>>, vector<1x128xf32>,
    return
  }
  func.func @transform_0(%arg0: i32) -> (i32, i32) {
    %c0_i32 = arith.constant 0 : i32
    %c0_i32_0 = arith.constant 0 : i32
    return %c0_i32, %arg0 : i32, i32
  }
  func.func @transform_1(%arg0: i32) -> (i32, i32) {
    %c0_i32 = arith.constant 0 : i32
    %c0_i32_0 = arith.constant 0 : i32
    %c0_i32_1 = arith.constant 0 : i32
    return %c0_i32, %c0_i32_0 : i32, i32
  }
  func.func @transform_2(%arg0: i32) -> (i32, i32) {
    %c0_i32 = arith.constant 0 : i32
    %c0_i32_0 = arith.constant 0 : i32
    %c0_i32_1 = arith.constant 0 : i32
    return %c0_i32, %c0_i32_0 : i32, i32
  }
  func.func @transform_3(%arg0: i32) -> (i32, i32) {
    %c0_i32 = arith.constant 0 : i32
    %c0_i32_0 = arith.constant 0 : i32
    %c0_i32_1 = arith.constant 0 : i32
    return %c0_i32, %c0_i32_0 : i32, i32
  }
  func.func @transform_4(%arg0: i32) -> (i32, i32) {
    %c0_i32 = arith.constant 0 : i32
    %c0_i32_0 = arith.constant 0 : i32
    %c0_i32_1 = arith.constant 0 : i32
    return %c0_i32, %c0_i32_0 : i32, i32
  }
  func.func @transform_5(%arg0: i32) -> (i32, i32) {
    %c0_i32 = arith.constant 0 : i32
    %c0_i32_0 = arith.constant 0 : i32
    %c0_i32_1 = arith.constant 0 : i32
    return %c0_i32, %c0_i32_0 : i32, i32
  }
  func.func @transform_6(%arg0: i32) -> (i32, i32) {
    %c0_i32 = arith.constant 0 : i32
    %c0_i32_0 = arith.constant 0 : i32
    %c0_i32_1 = arith.constant 0 : i32
    return %c0_i32, %c0_i32_0 : i32, i32
  }
  func.func @transform_7(%arg0: i32) -> (i32, i32) {
    %c0_i32 = arith.constant 0 : i32
    %c0_i32_0 = arith.constant 0 : i32
    return %c0_i32, %arg0 : i32, i32
  }
}

</mosaic_0001>

<bundles_post_ra>
// kernel: tpu_custom_call.1
= control target key start
LH: loop header
LB: loop body
LE: loop exit
PB: predicated region body
PF: predicated region fallthrough
CT: control target
= control target key end

     0   :  { %s589_s0 = inlined_call_operand.vmem [shape: bf16[16,128], index: 0, kind: input, shape index: {}]   ;;  %s590_s1 = inlined_call_operand.vmem [shape: bf16[64,16], index: 1, kind: input, shape index: {}]   ;;  %s591_s2 = inlined_call_operand.vmem [shape: f32[64,1], index: 2, kind: input, shape index: {}]   ;;  %s592_s3 = inlined_call_operand.vmem [shape: bf16[32,64], index: 3, kind: input, shape index: {}]   ;;  %s593_s4 = inlined_call_operand.vmem [shape: f32[32,1], index: 4, kind: input, shape index: {}]   ;;  %s594_s5 = inlined_call_operand.vmem [shape: f32[32,1], index: 5, kind: input, shape index: {}]   ;;  %s595_s6 = inlined_call_operand.<no memory space> [shape: f32[1,1], index: 6, kind: input, shape index: {}]   ;;  %s596_s7 = inlined_call_operand.hbm [shape: f32[1,128], index: 7, kind: output, shape index: {}]  }
   0x1   :  { %v12_v0 = vstv %s595_s6 }
   0x2   :  { %13 = vst [vmem:[#allocation2] sm:$0x1] %v12_v0 }
   0x3   :  { %v422_v1 = vld [vmem:[%s589_s0] sm:$0xff]   ;;  %vm114_vm0 = vcmask 130048   ;;  %v424_v3 = vld [vmem:[%s590_s1 + $0x8] sm:$0xff]   ;;  %v457_v4 = vmov 0   ;;  %v425_v5 = vld [vmem:[%s590_s1 + $0x10] sm:$0xff]  }
   0x4   :  { %v423_v2 = vld [vmem:[%s590_s1] sm:$0xff]   ;;  %396 = vmatprep.subr.bf16.mxu0 %v422_v1  ;;  %420 = vset.pattern.permute.xlu0 %v457_v4  ;;  %v42_v7 = vld [vmem:[%s591_s2 + $0x10] sm:$0xff]  ;;  %v41_v8 = vld [vmem:[%s591_s2 + $0x8] sm:$0xff] }
   0x5   :  { %397 = vmatpush3.bf16.msra.mxu0 %v422_v1  ;;  %398 = vmatprep.mubr.msk.bf16.mxu0 %vm114_vm0, %v423_v2  ;;  %v40_v6 = vld [vmem:[%s591_s2] sm:$0xff]  ;;  %v43_v9 = vld [vmem:[%s591_s2 + $0x18] sm:$0xff]  ;;  %v45_v12 = vld [vmem:[%s591_s2 + $0x28] sm:$0xff] }
   0x6   :  { %421 = vset.pattern.permute.xlu1 %v457_v4  ;;  %50 = vperm.xlu0 %420, %v40_v6   ;;  %v426_v10 = vld [vmem:[%s590_s1 + $0x18] sm:$0xff]   ;;  %v44_v11 = vld [vmem:[%s591_s2 + $0x20] sm:$0xff] }
   0x7   :  { %60 = vperm.xlu1 %421, %v42_v7  }
   0x8   :  { %399 = vmatmul.mubr.msk.bf16.vlgmr.msra.gmra.mrb[0].mxu0 %vm114_vm0, %v424_v3 }
   0x9   :  { %402 = vmatprep.mubr.msk.bf16.mxu0 %vm114_vm0, %v425_v5 }
   0xa   :  { %55 = vperm.xlu0 %420, %v41_v8  }
   0xb   :  { %65 = vperm.xlu1 %421, %v43_v9  }
   0xc   :  { %14 = vsyncpa [#allocation4], 0  ;;  %v46_v13 = vld [vmem:[%s591_s2 + $0x30] sm:$0xff]  ;;  %v47_v14 = vld [vmem:[%s591_s2 + $0x38] sm:$0xff]  ;;  %vm242_vm1 = vcmask 523264  }
   0xd   :  { %v208_v15 = vld [vmem:[%s593_s4] sm:$0xff]  ;;  %v209_v16 = vld [vmem:[%s593_s4 + $0x8] sm:$0xff]  ;;  %v210_v17 = vld [vmem:[%s593_s4 + $0x10] sm:$0xff] }
   0xe   :  { %70 = vperm.xlu0 %420, %v44_v11   ;;  %v211_v18 = vld [vmem:[%s593_s4 + $0x18] sm:$0xff]  ;;  %v302_v19 = vld [vmem:[%s594_s5] sm:$0xff]  ;;  %v303_v20 = vld [vmem:[%s594_s5 + $0x8] sm:$0xff] }
   0xf   :  { %75 = vperm.xlu1 %421, %v45_v12   ;;  %v304_v21 = vld [vmem:[%s594_s5 + $0x10] sm:$0xff]  ;;  %v305_v22 = vld [vmem:[%s594_s5 + $0x18] sm:$0xff]  ;;  %v339_v23 = vld [vmem:[#allocation2] sm:$0x1] }
  0x10   :  { %403 = vmatmul.mubr.msk.bf16.gmra.mrb[4].mxu0 %vm114_vm0, %v426_v10  ;;  %v427_v24 = vld [vmem:[%s592_s3] sm:$0xff]   ;;  %v428_v61 = vld [vmem:[%s592_s3 + $0x8] sm:$0xff]   ;;  %s458_s3 = smov [#allocation3]  }
  0x11   :  { %414 = vmatprep.mubr.msk.bf16.mxu1 %vm242_vm1, %v427_v24  ;;  %v345_v24 = vlaneseq  ;;  %s363_s18 = sshll.u32 %s458_s3, 4  ;;  %s364_s18 = int_to_ptr.vmem [resolvable:$true] %s363_s18 }
  0x12   :  { %80 = vperm.xlu0 %420, %v46_v13   ;;  %s433_s19 = scalar_lea.vmem %s364_s18, 16  ;;  %s437_s20 = scalar_lea.vmem %s364_s18, 32 }
  0x13   :  { %85 = vperm.xlu1 %421, %v47_v14   ;;  %p434_p0 = scmp.ne.s32.totalorder %s364_s18, %s433_s19  ;;  %p438_p1 = scmp.lt.s32.totalorder %s364_s18, %s364_s18 }
  0x14   :  { %p439_p2 = scmp.lt.s32.totalorder %s437_s20, %s433_s19 }
  0x16   :  { %214 = vperm.xlu0 %420, %v208_v15   ;;  %p440_p3 = por %p439_p2, %p438_p1 }
  0x17   :  { %219 = vperm.xlu1 %421, %v209_v16  }
  0x18   :  { %p441_p4 = pnand %p440_p3, %p434_p0 }
  0x1a   :  { %224 = vperm.xlu0 %420, %v210_v17  }
  0x1b   :  { %229 = vperm.xlu1 %421, %v211_v18  }
  0x1e   :  { %308 = vperm.xlu0 %420, %v302_v19  }
  0x1f   :  { %313 = vperm.xlu1 %421, %v303_v20  }
  0x22   :  { %318 = vperm.xlu0 %420, %v304_v21  }
  0x23   :  { %323 = vperm.xlu1 %421, %v305_v22  }
  0x26   :  { %342 = vperm.xlu0 %420, %v339_v23  }
  0x85   :  { %v51_v25 = vpop.permute.xlu0 %50 }
  0x86   :  { %v61_v26 = vpop.permute.xlu1 %60 }
  0x89   :  { %v56_v27 = vpop.permute.xlu0 %55 }
  0x8a   :  { %v66_v28 = vpop.permute.xlu1 %65 }
  0x8d   :  { %v71_v32 = vpop.permute.xlu0 %70 }
  0x8e   :  { %v76_v37 = vpop.permute.xlu1 %75 }
  0x91   :  { %v81_v44 = vpop.permute.xlu0 %80 }
  0x92   :  { %v86_v49 = vpop.permute.xlu1 %85 }
  0x95   :  { %v215_v62 = vpop.permute.xlu0 %214 }
  0x96   :  { %v220_v63 = vpop.permute.xlu1 %219 }
  0x99   :  { %v225_v0 = vpop.permute.xlu0 %224 }
  0x9a   :  { %v230_v1 = vpop.permute.xlu1 %229 }
  0x9d   :  { %v309_v7 = vpop.permute.xlu0 %308 }
  0x9e   :  { %v314_v12 = vpop.permute.xlu1 %313 }
  0xa1   :  { %v319_v18 = vpop.permute.xlu0 %318 }
  0xa2   :  { %v324_v21 = vpop.permute.xlu1 %323 }
  0xdb   :  { %v400_v29 = vpop.f32.mrb[0].mxu0 }
  0xdc   :  { %v170_v30 = vadd.f32 %v400_v29, %v61_v26  ;;  %v161_v31 = vpop.f32.mrb[1].mxu0 }
  0xdd   :  { %v162_v33 = vadd.f32 %v161_v31, %v51_v25  ;;  %v401_v34 = vpop.f32.mrb[2].mxu0 }
  0xde   :  { %v173_v35 = vadd.f32 %v401_v34, %v66_v28  ;;  %v164_v36 = vpop.f32.mrb[3].mxu0  ;;  %v194_v39 = vmax.f32 %v170_v30, 0.0 }
  0xdf   :  { %v165_v38 = vadd.f32 %v164_v36, %v56_v27  ;;  %v192_v41 = vmax.f32 %v162_v33, 0.0  ;;  %v346_v27 = vshrl.u32 %v345_v24, 7 }
  0xe0   :  { %v195_v40 = vmax.f32 %v173_v35, 0.0 }
  0xe1   :  { %v193_v42 = vmax.f32 %v165_v38, 0.0  ;;  %v347_v30 = vsub.s32 0, %v346_v27 }
  0xe2   :  { %v205_v43 = vpack.c.bf16 %v195_v40, %v194_v39 }
  0xe3   :  { %v404_v45 = vpop.f32.mrb[4].mxu0  ;;  %v204_v46 = vpack.c.bf16 %v193_v42, %v192_v41 }
  0xe4   :  { %v186_v47 = vadd.f32 %v404_v45, %v81_v44  ;;  %v177_v48 = vpop.f32.mrb[5].mxu0 }
  0xe5   :  { %v178_v50 = vadd.f32 %v177_v48, %v71_v32  ;;  %v405_v51 = vpop.f32.mrb[6].mxu0  ;;  %406 = vmatprep.subr.bf16.mxu1 %v204_v46  ;;  %v343_v32 = vpop.permute.xlu0 %342 }
  0xe6   :  { %v189_v52 = vadd.f32 %v405_v51, %v86_v49  ;;  %v180_v53 = vpop.f32.mrb[7].mxu0  ;;  %407 = vmatpush3.bf16.msra.mxu1 %v204_v46  ;;  %v198_v55 = vmax.f32 %v186_v47, 0.0  ;;  %v348_v34 = vrot.slane %v343_v32, %v347_v30 }
  0xe7   :  { %v181_v54 = vadd.f32 %v180_v53, %v76_v37  ;;  %408 = vmatprep.subr.bf16.mxu1 %v205_v43  ;;  %v196_v57 = vmax.f32 %v178_v50, 0.0 }
  0xe8   :  { %v199_v56 = vmax.f32 %v189_v52, 0.0 }
  0xe9   :  { %v197_v58 = vmax.f32 %v181_v54, 0.0 }
  0xea   :  { %v207_v59 = vpack.c.bf16 %v199_v56, %v198_v55  ;;  %409 = vmatpush3.bf16.msra.mxu1 %v205_v43 }
  0xeb   :  { %v206_v60 = vpack.c.bf16 %v197_v58, %v196_v57 }
  0xed   :  { %410 = vmatprep.subr.bf16.mxu1 %v206_v60 }
  0xee   :  { %411 = vmatpush3.bf16.msra.mxu1 %v206_v60 }
  0xef   :  { %412 = vmatprep.subr.bf16.mxu1 %v207_v59 }
  0xf2   :  { %413 = vmatpush3.bf16.msra.mxu1 %v207_v59 }
  0xf5   :  { %415 = vmatmul.mubr.msk.bf16.vlgmr.msra.gmra.mrb[0].mxu1 %vm242_vm1, %v428_v61 }
 0x1c8   :  { %v416_v2 = vpop.f32.mrb[0].mxu1 }
 0x1c9   :  { %v283_v3 = vpop.f32.mrb[1].mxu1  ;;  %v292_v4 = vadd.f32 %v416_v2, %v225_v0 }
 0x1ca   :  { %v284_v5 = vadd.f32 %v283_v3, %v215_v62  ;;  %v417_v6 = vpop.f32.mrb[2].mxu1 }
 0x1cb   :  { %v286_v8 = vpop.f32.mrb[3].mxu1  ;;  %v295_v10 = vadd.f32 %v417_v6, %v230_v1  ;;  %v300_v13 = vmax.f32 %v292_v4, 0.0 }
 0x1cc   :  { %v298_v9 = vmax.f32 %v284_v5, 0.0  ;;  %v287_v11 = vadd.f32 %v286_v8, %v220_v63 }
 0x1cd   :  { %v301_v16 = vmax.f32 %v295_v10, 0.0  ;;  %v328_v19 = vmul.f32 %v319_v18, %v300_v13 }
 0x1ce   :  { %v299_v14 = vmax.f32 %v287_v11, 0.0  ;;  %v326_v15 = vmul.f32 %v309_v7, %v298_v9 }
 0x1cf   :  { %v329_v22 = vmul.f32 %v324_v21, %v301_v16 }
 0x1d0   :  { %v327_v17 = vmul.f32 %v314_v12, %v299_v14 }
 0x1d2   :  { %v330_v20 = vadd.f32 %v327_v17, %v326_v15 }
 0x1d4   :  { %v331_v23 = vadd.f32 %v330_v20, %v328_v19 }
 0x1d6   :  { %v332_v25 = vadd.f32 %v331_v23, %v329_v22 }
 0x1d8   :  { %v333_v26 = vrot.slane %v332_v25, 4 }
 0x1da   :  { %v334_v28 = vadd.f32 %v333_v26, %v332_v25 }
 0x1dc   :  { %v335_v29 = vrot.slane %v334_v28, 2 }
 0x1de   :  { %v336_v31 = vadd.f32 %v335_v29, %v334_v28 }
 0x1e0   :  { %v337_v33 = vrot.slane %v336_v31, 1 }
 0x1e2   :  { %v338_v35 = vadd.f32 %v337_v33, %v336_v31 }
 0x1e4   :  { %v349_v36 = vadd.f32 %v348_v34, %v338_v35 }
 0x1e6   :  { %v384_v37 = vmul.f32 -1.442695, %v349_v36 }
 0x1e8   :  { %429 = vpow2.f32 %v384_v37 }
 0x1f2   :  { %v430_v38 = vpop.eup %429 }
 0x1f3   :  { %v353_v39 = vadd.f32 1.0, %v430_v38 }
 0x1f5   :  { %431 = vrcp.f32 %v353_v39 }
 0x1ff   :  { %v432_v40 = vpop.eup %431 }
 0x200   :  { %356 = vst [vmem:[#allocation3] sm:$0x1] %v432_v40 }
 0x201   :  { %444 = shalt.err (!%p441_p4)
}
 0x202   :  { %s445_s23 = scalar_lea.hbm %s596_s7, 16 }
 0x203   :  { %p446_p5 = scmp.ne.s32.totalorder %s596_s7, %s445_s23  ;;  %p449_p6 = scmp.lt.u32.totalorder %s445_s23, %s596_s7 }
 0x205   :  { %p451_p7 = pnand %p449_p6, %p446_p5 }
 0x207   :  { %454 = shalt.err (!%p451_p7)
}
 0x208   :  { %366 = dma.vmem_to_hbm [thread:$0]  %s364_s18, 16, %s596_s7, [#allocation4]  }
 0x209   :  { %455 = dma.done.wait [#allocation4], 16  }
 0x20a   :  { %456 = vsyncadd [#allocation4], 4294967280 }
 0x20b   :  { %370 = vsyncpa [#allocation4], 1 }

</bundles_post_ra>
